<compile_context>
chip_gen: v6e
topology: v6e:2x2x1
jax: 0.10.0
libtpu: 0.0.40
codegen_flags: <defaults>
</compile_context>

<pallas_src>
import jax
import jax.numpy as jnp
from jax.experimental import pallas as pl
from jax.experimental.pallas import tpu as pltpu

IN_FEATURES = 101
OUT_FEATURES = 21


def _round_up(n, m):
    return ((n + m - 1) // m) * m


def _head_kernel(w_ref, b_ref, x_ref, o_ref):
    # w_ref: (101, 21) bf16   weight, transposed once in the wrapper, VMEM-resident
    # b_ref: (1, 21)   f32    bias (broadcast over the batch rows)
    # x_ref: (tb, 101) f32    activation tile, natural layout
    # o_ref: (tb, 21)  f32    output tile, natural layout
    x = x_ref[...].astype(w_ref.dtype)  # in-kernel bf16 cast (VPU, hidden by DMA)
    acc = jnp.dot(x, w_ref[...], preferred_element_type=jnp.float32)
    o_ref[...] = (acc + b_ref[...]).astype(o_ref.dtype)


def head_forward(x, weight, bias, *, block_b=8192, weight_dtype=jnp.bfloat16):
    """Linear(101 -> 21).

    x:      (B, 101) float32
    weight: (21, 101) float32   (PyTorch nn.Linear layout: (out, in))
    bias:   (21,)     float32
    returns (B, 21)   float32
    """
    B = x.shape[0]
    out_dtype = x.dtype

    # ---- one-time parameter prep (tiny): transpose to (in, out), cast weight ----
    w_t = weight.T.astype(weight_dtype)                       # (101, 21)
    b_r = bias.astype(jnp.float32).reshape(1, OUT_FEATURES)   # (1, 21)

    # ---- batch tiling: sublane-align (8) and balance tiles so padding stays tiny ----
    b8 = _round_up(max(B, 1), 8)
    tb_target = max(8, _round_up(min(block_b, b8), 8))
    n_tiles = pl.cdiv(b8, tb_target)
    tb = _round_up(-(-b8 // n_tiles), 8)       # balanced tile size, multiple of 8
    b_pad = n_tiles * tb                        # total pad < 8 * n_tiles rows

    if b_pad == B:
        x_p = x                                 # common case: no extra HBM pass
    else:
        x_p = jnp.zeros((b_pad, IN_FEATURES), x.dtype).at[:B].set(x)

    out = pl.pallas_call(
        _head_kernel,
        out_shape=jax.ShapeDtypeStruct((b_pad, OUT_FEATURES), jnp.float32),
        grid_spec=pltpu.PrefetchScalarGridSpec(
            num_scalar_prefetch=0,
            grid=(n_tiles,),
            in_specs=[
                # weight / bias: same block every step -> DMA once, VMEM-resident
                pl.BlockSpec((IN_FEATURES, OUT_FEATURES), lambda i: (0, 0)),
                pl.BlockSpec((1, OUT_FEATURES), lambda i: (0, 0)),
                # activations: one batch tile per grid step (double-buffered)
                pl.BlockSpec((tb, IN_FEATURES), lambda i: (i, 0)),
            ],
            out_specs=pl.BlockSpec((tb, OUT_FEATURES), lambda i: (i, 0)),
        ),
        compiler_params=pltpu.CompilerParams(
            # batch tiles are independent; shards across v7x's two TensorCores
            dimension_semantics=("parallel",),
        ),
    )(w_t, b_r, x_p)

    out = out if b_pad == B else out[:B]
    return out.astype(out_dtype)


def init_head_params(key):
    """Match nn.Linear init: U(-1/sqrt(fan_in), 1/sqrt(fan_in)), PyTorch layout."""
    kw, kb = jax.random.split(key)
    bound = 1.0 / jnp.sqrt(jnp.float32(IN_FEATURES))
    weight = jax.random.uniform(
        kw, (OUT_FEATURES, IN_FEATURES), jnp.float32, minval=-bound, maxval=bound
    )
    bias = jax.random.uniform(
        kb, (OUT_FEATURES,), jnp.float32, minval=-bound, maxval=bound
    )
    return weight, bias


if __name__ == "__main__":
    key = jax.random.PRNGKey(0)
    k_x, k_p = jax.random.split(key)

    batch = 8
    x = jax.random.normal(k_x, (batch, IN_FEATURES), dtype=jnp.float32)
    weight, bias = init_head_params(k_p)

    out = jax.block_until_ready(head_forward(x, weight, bias))

    # Reference with the same bf16 rounding the kernel applies (x cast in-kernel,
    # weight cast in the wrapper), accumulated in f32 (matches MXU bf16 x bf16 -> f32).
    x_c = x.astype(jnp.bfloat16).astype(jnp.float32)
    w_c = weight.astype(jnp.bfloat16).astype(jnp.float32)
    ref = x_c @ w_c.T + bias[None, :]

    assert out.shape == (batch, OUT_FEATURES)
    assert jnp.allclose(out, ref, atol=2e-3, rtol=2e-3)

    # Loose check against the pure-f32 module output (bf16 rounding only).
    ref_f32 = x @ weight.T + bias[None, :]
    assert jnp.allclose(out, ref_f32, atol=5e-2, rtol=5e-2)

    print("KERNEL_OK")
</pallas_src>

<mosaic_0001>
module attributes {stable_mosaic.version = 11 : i64} {
  func.func @_head_kernel(%arg0: i32, %arg1: memref<101x21xbf16, #tpu.memory_space<vmem>>, %arg2: memref<1x21xf32, #tpu.memory_space<vmem>>, %arg3: memref<8x101xf32, #tpu.memory_space<vmem>>, %arg4: memref<8x21xf32, #tpu.memory_space<vmem>>) attributes {dimension_semantics = [#tpu.dimension_semantics<parallel>], iteration_bounds = array<i64: 1>, scalar_prefetch = 0 : i64, scratch_operands = 0 : i64, tpu.core_type = #tpu.core_type<tc>, window_params = [{pipeline_mode = #tpu.pipeline_mode<synchronous>, transform_indices = @transform_0, window_bounds = array<i64: 101, 21>}, {pipeline_mode = #tpu.pipeline_mode<synchronous>, transform_indices = @transform_1, window_bounds = array<i64: 1, 21>}, {transform_indices = @transform_2, window_bounds = array<i64: 8, 101>}, {transform_indices = @transform_3, window_bounds = array<i64: 8, 21>}]} {
    %c0 = arith.constant 0 : index
    %c0_0 = arith.constant 0 : index
    %0 = vector.load %arg3[%c0, %c0_0] : memref<8x101xf32, #tpu.memory_space<vmem>>, vector<8x101xf32>
    %1 = arith.truncf %0 : vector<8x101xf32> to vector<8x101xbf16>
    %c0_1 = arith.constant 0 : index
    %c0_2 = arith.constant 0 : index
    %2 = vector.load %arg1[%c0_1, %c0_2] : memref<101x21xbf16, #tpu.memory_space<vmem>>, vector<101x21xbf16>
    %cst = arith.constant dense<0.000000e+00> : vector<8x21xf32>
    %3 = tpu.matmul %1, %2, %cst {dimension_numbers = #tpu.dot_dimension_numbers<[1], [0], [0], [1], [0, 0, 1, 1], [], []>} : vector<8x101xbf16>, vector<101x21xbf16>, vector<8x21xf32> -> vector<8x21xf32>
    %c0_3 = arith.constant 0 : index
    %c0_4 = arith.constant 0 : index
    %4 = vector.load %arg2[%c0_3, %c0_4] : memref<1x21xf32, #tpu.memory_space<vmem>>, vector<1x21xf32>
    %5 = vector.broadcast %4 : vector<1x21xf32> to vector<8x21xf32>
    %6 = arith.addf %3, %5 : vector<8x21xf32>
    %c0_5 = arith.constant 0 : index
    %c0_6 = arith.constant 0 : index
    %7 = vector.load %arg4[%c0_5, %c0_6] : memref<8x21xf32, #tpu.memory_space<vmem>>, vector<8x21xf32>
    tpu.vector_store %arg4[%c0_5, %c0_6], %6 {strides = array<i32>} : memref<8x21xf32, #tpu.memory_space<vmem>>, vector<8x21xf32>,
    return
  }
  func.func @transform_0(%arg0: i32) -> (i32, i32) {
    %c0_i32 = arith.constant 0 : i32
    %c0_i32_0 = arith.constant 0 : i32
    %c0_i32_1 = arith.constant 0 : i32
    return %c0_i32, %c0_i32_0 : i32, i32
  }
  func.func @transform_1(%arg0: i32) -> (i32, i32) {
    %c0_i32 = arith.constant 0 : i32
    %c0_i32_0 = arith.constant 0 : i32
    %c0_i32_1 = arith.constant 0 : i32
    return %c0_i32, %c0_i32_0 : i32, i32
  }
  func.func @transform_2(%arg0: i32) -> (i32, i32) {
    %c0_i32 = arith.constant 0 : i32
    %c0_i32_0 = arith.constant 0 : i32
    return %arg0, %c0_i32 : i32, i32
  }
  func.func @transform_3(%arg0: i32) -> (i32, i32) {
    %c0_i32 = arith.constant 0 : i32
    %c0_i32_0 = arith.constant 0 : i32
    return %arg0, %c0_i32 : i32, i32
  }
}

</mosaic_0001>

<bundles_post_ra>
// kernel: tpu_custom_call.1
= control target key start
LH: loop header
LB: loop body
LE: loop exit
PB: predicated region body
PF: predicated region fallthrough
CT: control target
= control target key end

     0   :  { %v212_v1 = vmov 0.0   ;;  %vm81_vm0 = vcmask 1041408   ;;  %vm82_vm1 = vcmask 1042432   ;;  %v213_v2 = vmov 65535   ;;  %s266_s0 = inlined_call_operand.vmem [shape: bf16[101,21], index: 0, kind: input, shape index: {}]   ;;  %s267_s1 = inlined_call_operand.vmem [shape: f32[1,21], index: 1, kind: input, shape index: {}]   ;;  %s268_s2 = inlined_call_operand.vmem [shape: f32[8,101], index: 2, kind: input, shape index: {}]   ;;  %s269_s3 = inlined_call_operand.hbm [shape: f32[8,21], index: 3, kind: output, shape index: {}]  }
   0x1   :  { %v183_v0 = vld [vmem:[%s266_s0 + $0x30] ss:$0 sps:$4 sm:$0x77]   ;;  %161 = vmatprep.subr.bf16.mxu0 %v212_v1  ;;  %v83_v3 = vsel %vm81_vm0, 4294967295, %v213_v2  ;;  %v184_v6 = vld [vmem:[%s266_s0 + $0x28] sm:$0xff]   ;;  %vm214_vm2 = vmmov 0  }
   0x2   :  { %v84_v4 = vsel %vm82_vm1, %v83_v3, 0  ;;  %175 = vmatprep.mubr.msk.bf16.mxu0 %vm214_vm2, %v212_v1 }
   0x3   :  { %v86_v5 = vand.u32 %v183_v0, %v84_v4 }
   0x5   :  { %162 = vmatpush3.bf16.msra.mxu0 %v86_v5 }
   0x6   :  { %163 = vmatprep.subr.bf16.mxu0 %v212_v1 }
   0x7   :  { %8 = vsyncpa [#allocation3], 0  ;;  %v185_v7 = vld [vmem:[%s266_s0 + $0x20] sm:$0xff]   ;;  %v186_v8 = vld [vmem:[%s266_s0 + $0x18] sm:$0xff]   ;;  %vm77_vm3 = vcmask 826368   ;;  %s215_s30 = smov [#allocation2]  }
   0x8   :  { %v187_v9 = vld [vmem:[%s266_s0 + $0x10] sm:$0xff]   ;;  %v188_v10 = vld [vmem:[%s266_s0 + $0x8] sm:$0xff]   ;;  %v189_v11 = vld [vmem:[%s266_s0] sm:$0xff]   ;;  %s136_s4 = sshll.u32 %s215_s30, 4  ;;  %vm128_vm4 = vcmask 171008   ;;  %s137_s4 = int_to_ptr.vmem [resolvable:$true] %s136_s4 }
   0x9   :  { %164 = vmatpush3.bf16.msra.mxu0 %v184_v6  ;;  %v16_v12 = vld [vmem:[%s268_s2] sm:$0xff]  ;;  %s190_s0 = scalar_lea.vmem %s137_s4, 128  ;;  %p195_p1 = scmp.lt.s32.totalorder %s137_s4, %s137_s4 }
   0xa   :  { %165 = vmatprep.subr.bf16.mxu0 %v212_v1  ;;  %v17_v13 = vpack.c.bf16 %v16_v12, %v16_v12  ;;  %v144_v14 = vld [vmem:[%s267_s1] ss:$0 sm:$0xff]  ;;  %p191_p0 = scmp.ne.s32.totalorder %s137_s4, %s190_s0  ;;  %p196_p2 = scmp.lt.s32.totalorder %s190_s0, %s190_s0 }
   0xc   :  { %p197_p3 = por %p196_p2, %p195_p1 }
   0xd   :  { %166 = vmatpush3.bf16.msra.mxu0 %v185_v7 }
   0xe   :  { %167 = vmatprep.subr.bf16.mxu0 %v212_v1  ;;  %p198_p4 = pnand %p197_p3, %p191_p0 }
  0x11   :  { %168 = vmatpush3.bf16.msra.mxu0 %v186_v8 }
  0x12   :  { %169 = vmatprep.subr.bf16.mxu0 %v212_v1 }
  0x15   :  { %170 = vmatpush3.bf16.msra.mxu0 %v187_v9 }
  0x16   :  { %171 = vmatprep.subr.bf16.mxu0 %v212_v1 }
  0x19   :  { %172 = vmatpush3.bf16.msra.mxu0 %v188_v10 }
  0x1a   :  { %173 = vmatprep.subr.bf16.mxu0 %v212_v1 }
  0x1d   :  { %174 = vmatpush3.bf16.msra.mxu0 %v189_v11 }
  0x20   :  { %176 = vmatmul.mubr.msk.bf16.vlgmr.msra.gmra.mxu0 %vm77_vm3, %v17_v13 }
  0xe0   :  { %v122_v15 = vpop.f32.mrf.mxu0 }
  0xe1   :  { %v123_v16 = vadd.f32 %v144_v14, %v122_v15 }
  0xe2   :  { %v177_v17 = vpop.f32.mrf.mxu0 }
  0xe3   :  { %129 = vst.msk [vmem:[#allocation2] sm:$0xff] %vm128_vm4, %v123_v16 }
  0xe4   :  { %v125_v18 = vpop.f32.mrf.mxu0 }
  0xe5   :  { %201 = shalt.err (!%p198_p4)
}
  0xe6   :  { %139 = dma.vmem_to_hbm [thread:$0]  %s137_s4, 128, %s269_s3, [#allocation3]   ;;  %v178_v19 = vpop.f32.mrf.mxu0 }
  0xe7   :  { %210 = dma.done.wait [#allocation3], 128  }
  0xe8   :  { %211 = vsyncadd [#allocation3], 4294967168 }
  0xe9   :  { %143 = vsyncpa [#allocation3], 1 }

</bundles_post_ra>
